<compile_context>
chip_gen: v7x
topology: tpu7x:2x2x1
jax: 0.10.0
libtpu: 0.0.40
codegen_flags: <defaults>
</compile_context>

<pallas_src>
import functools

import jax
import jax.numpy as jnp
from jax.experimental import pallas as pl
from jax.experimental.pallas import tpu as pltpu


def _round_up(x, m):
    return ((x + m - 1) // m) * m


def _choose_tile_n(n_total, tile_n):
    """Row-tile size: big, multiple of 8, and the grid keeps >= 2 steps."""
    if n_total <= 8:
        return n_total                      # single block == full dim -> legal
    t = min(_round_up(tile_n, 8), _round_up(n_total, 8))
    # Keep at least two grid steps so the "parallel" axis can shard across the
    # two TensorCores on v7x (no effect on 1-TC v5e/v6e).
    t = min(t, _round_up(pl.cdiv(n_total, 2), 8))
    return max(t, 8)


def _patch_embed_kernel(x_ref, w_ref, p_ref, o_ref, *, eps, e_dim):
    # x_ref: (tile_n, K) bf16    w_ref: (K, E) bf16 (resident, constant index)
    # p_ref: (3, E) f32  [bias; gamma; beta]        o_ref: (tile_n, E)
    y = jnp.dot(x_ref[...], w_ref[...], preferred_element_type=jnp.float32)

    params = p_ref[...]                      # (3, E) f32, resident
    bias = params[0:1, :]
    gamma = params[1:2, :]
    beta = params[2:3, :]

    y = y + bias

    # Two-pass LayerNorm over embed_dim (biased variance, like torch).
    inv_e = jnp.float32(1.0 / e_dim)
    mean = jnp.sum(y, axis=-1, keepdims=True) * inv_e
    yc = y - mean
    var = jnp.sum(yc * yc, axis=-1, keepdims=True) * inv_e
    y_norm = yc * jax.lax.rsqrt(var + eps)

    o_ref[...] = (y_norm * gamma + beta).astype(o_ref.dtype)


def patch_embed_with_size(x, w, b, gamma, beta, patch_size, *, eps=1e-5,
                          tile_n=512, out_dtype=jnp.bfloat16):
    """x: (B, C, H, W); w: (E, C, P, P) (PyTorch OIHW); b/gamma/beta: (E,)."""
    B, C, H, W = x.shape
    P = patch_size
    assert H % P == 0, "Input image height must be divisible by patch size."
    assert W % P == 0, "Input image width must be divisible by patch size."
    Gh, Gw = H // P, W // P
    E = w.shape[0]
    K = C * P * P
    n_total = B * Gh * Gw
    out_dtype = x.dtype if out_dtype is None else out_dtype

    # --- wrapper-side glue (see TODO above for fusing the patchify) ---------
    # Patchify: cast to bf16 FIRST so the transpose writes half the bytes.
    # (B,C,H,W) -> (B, Gh, Gw, C, P, P) -> (B*Gh*Gw, C*P*P); row-major over
    # (C, Ph, Pw) matches the PyTorch OIHW weight flatten below.
    x_bf = x.astype(jnp.bfloat16)
    xp = x_bf.reshape(B, C, Gh, P, Gw, P)
    xp = xp.transpose(0, 2, 4, 1, 3, 5).reshape(n_total, K)

    # Weight: cast before the relayout; (E, C, P, P) -> (K, E) bf16.
    wf = jnp.transpose(w.astype(jnp.bfloat16).reshape(E, K))

    # Bias / gamma / beta stacked into one resident (3, E) f32 block.
    params = jnp.stack([b, gamma, beta], axis=0).astype(jnp.float32)

    # --- tiling -------------------------------------------------------------
    tile_eff = _choose_tile_n(n_total, tile_n)
    grid = (pl.cdiv(n_total, tile_eff),)     # ragged last block is fine (row-wise ops)

    # VMEM budget (double-buffered blocks), capped so it is legal on every
    # generation (v7x physical VMEM is 64 MiB).
    out_bytes = jnp.dtype(out_dtype).itemsize
    block_bytes = (2 * tile_eff * K * 2          # x tile
                   + 2 * tile_eff * E * out_bytes  # out tile
                   + 2 * K * E * 2               # weight (constant index map)
                   + 2 * 3 * E * 4)              # params
    vmem_limit = int(min(max(2 * block_bytes, 16 << 20), 48 << 20))

    out = pl.pallas_call(
        functools.partial(_patch_embed_kernel, eps=eps, e_dim=E),
        out_shape=jax.ShapeDtypeStruct((n_total, E), out_dtype),
        grid_spec=pltpu.PrefetchScalarGridSpec(
            num_scalar_prefetch=0,
            grid=grid,
            in_specs=[
                pl.BlockSpec((tile_eff, K), lambda i: (i, 0)),
                pl.BlockSpec((K, E), lambda i: (0, 0)),
                pl.BlockSpec((3, E), lambda i: (0, 0)),
            ],
            out_specs=pl.BlockSpec((tile_eff, E), lambda i: (i, 0)),
        ),
        compiler_params=pltpu.CompilerParams(
            dimension_semantics=("parallel",),
            vmem_limit_bytes=vmem_limit,
        ),
    )(xp, wf, params)

    out = out.reshape(B, Gh * Gw, E)
    grid_size = (Gh, Gw)
    return out, grid_size


def _reference(x, w, b, gamma, beta, patch_size, eps=1e-5):
    """Plain-JAX f32 reference: conv (kernel==stride==patch) + flatten + LayerNorm."""
    B = x.shape[0]
    E = w.shape[0]
    y = jax.lax.conv_general_dilated(
        x, w, window_strides=(patch_size, patch_size), padding="VALID",
        dimension_numbers=("NCHW", "OIHW", "NCHW"))
    y = y + b[None, :, None, None]
    gh, gw = y.shape[2], y.shape[3]
    y = y.reshape(B, E, gh * gw).transpose(0, 2, 1)   # (B, N, E)
    mean = jnp.mean(y, axis=-1, keepdims=True)
    var = jnp.mean(jnp.square(y - mean), axis=-1, keepdims=True)
    y = (y - mean) * jax.lax.rsqrt(var + eps)
    return y * gamma + beta, (gh, gw)


if __name__ == "__main__":
    # Small shapes consistent with the module (patch-size strided projection).
    B, C, H, W = 2, 3, 32, 32
    P = 8
    E = 128  # embed_dim (lane-dense: multiple of 128)

    key = jax.random.PRNGKey(0)
    k_x, k_w, k_b, k_g, k_be = jax.random.split(key, 5)
    x = jax.random.normal(k_x, (B, C, H, W), dtype=jnp.float32)
    w = jax.random.normal(k_w, (E, C, P, P), dtype=jnp.float32) * 0.02
    b = jax.random.normal(k_b, (E,), dtype=jnp.float32) * 0.02
    gamma = 1.0 + 0.1 * jax.random.normal(k_g, (E,), dtype=jnp.float32)
    beta = 0.1 * jax.random.normal(k_be, (E,), dtype=jnp.float32)

    out, grid_size = patch_embed_with_size(x, w, b, gamma, beta, P,
                                           out_dtype=jnp.bfloat16)
    out = jax.block_until_ready(out)

    ref, ref_grid = _reference(x, w, b, gamma, beta, P)
    assert out.shape == (B, (H // P) * (W // P), E)
    assert out.dtype == jnp.bfloat16
    assert grid_size == ref_grid
    out_f32 = out.astype(jnp.float32)
    # bf16 matmul inputs + bf16 output vs f32 reference -> relaxed tolerance.
    err = float(jnp.max(jnp.abs(out_f32 - ref)))
    assert jnp.allclose(out_f32, ref, rtol=2e-2, atol=3e-2), err

    print("KERNEL_OK")
</pallas_src>

<mosaic_0001>
module attributes {stable_mosaic.version = 11 : i64} {
  func.func @_patch_embed_kernel(%arg0: i32, %arg1: memref<16x192xbf16, #tpu.memory_space<vmem>>, %arg2: memref<192x128xbf16, #tpu.memory_space<vmem>>, %arg3: memref<3x128xf32, #tpu.memory_space<vmem>>, %arg4: memref<16x128xbf16, #tpu.memory_space<vmem>>) attributes {dimension_semantics = [#tpu.dimension_semantics<parallel>], iteration_bounds = array<i64: 2>, scalar_prefetch = 0 : i64, scratch_operands = 0 : i64, tpu.core_type = #tpu.core_type<tc>, window_params = [{transform_indices = @transform_0, window_bounds = array<i64: 16, 192>}, {pipeline_mode = #tpu.pipeline_mode<synchronous>, transform_indices = @transform_1, window_bounds = array<i64: 192, 128>}, {pipeline_mode = #tpu.pipeline_mode<synchronous>, transform_indices = @transform_2, window_bounds = array<i64: 3, 128>}, {transform_indices = @transform_3, window_bounds = array<i64: 16, 128>}]} {
    %c0 = arith.constant 0 : index
    %c0_0 = arith.constant 0 : index
    %0 = vector.load %arg1[%c0, %c0_0] : memref<16x192xbf16, #tpu.memory_space<vmem>>, vector<16x192xbf16>
    %c0_1 = arith.constant 0 : index
    %c0_2 = arith.constant 0 : index
    %1 = vector.load %arg2[%c0_1, %c0_2] : memref<192x128xbf16, #tpu.memory_space<vmem>>, vector<192x128xbf16>
    %cst = arith.constant dense<0.000000e+00> : vector<16x128xf32>
    %2 = tpu.matmul %0, %1, %cst {dimension_numbers = #tpu.dot_dimension_numbers<[1], [0], [0], [1], [0, 0, 1, 1], [], []>} : vector<16x192xbf16>, vector<192x128xbf16>, vector<16x128xf32> -> vector<16x128xf32>
    %c0_3 = arith.constant 0 : index
    %c0_4 = arith.constant 0 : index
    %3 = vector.load %arg3[%c0_3, %c0_4] : memref<3x128xf32, #tpu.memory_space<vmem>>, vector<3x128xf32>
    %4 = vector.extract_strided_slice %3 {offsets = [0, 0], sizes = [1, 128], strides = [1, 1]} : vector<3x128xf32> to vector<1x128xf32>
    %5 = vector.extract_strided_slice %3 {offsets = [1, 0], sizes = [1, 128], strides = [1, 1]} : vector<3x128xf32> to vector<1x128xf32>
    %6 = vector.extract_strided_slice %3 {offsets = [2, 0], sizes = [1, 128], strides = [1, 1]} : vector<3x128xf32> to vector<1x128xf32>
    %7 = vector.broadcast %4 : vector<1x128xf32> to vector<16x128xf32>
    %8 = arith.addf %2, %7 : vector<16x128xf32>
    %cst_5 = arith.constant dense<0.000000e+00> : vector<16xf32>
    %9 = vector.multi_reduction <add>, %8, %cst_5 [1] : vector<16x128xf32> to vector<16xf32>
    %10 = vector.shape_cast %9 : vector<16xf32> to vector<16x1xf32>
    %cst_6 = arith.constant 7.812500e-03 : f32
    %11 = vector.broadcast %cst_6 : f32 to vector<16x1xf32>
    %12 = arith.mulf %10, %11 : vector<16x1xf32>
    %13 = vector.broadcast %12 : vector<16x1xf32> to vector<16x128xf32>
    %14 = arith.subf %8, %13 : vector<16x128xf32>
    %15 = arith.mulf %14, %14 : vector<16x128xf32>
    %cst_7 = arith.constant dense<0.000000e+00> : vector<16xf32>
    %16 = vector.multi_reduction <add>, %15, %cst_7 [1] : vector<16x128xf32> to vector<16xf32>
    %17 = vector.shape_cast %16 : vector<16xf32> to vector<16x1xf32>
    %cst_8 = arith.constant 7.812500e-03 : f32
    %18 = vector.broadcast %cst_8 : f32 to vector<16x1xf32>
    %19 = arith.mulf %17, %18 : vector<16x1xf32>
    %cst_9 = arith.constant 9.99999974E-6 : f32
    %20 = vector.broadcast %cst_9 : f32 to vector<16x1xf32>
    %21 = arith.addf %19, %20 : vector<16x1xf32>
    %22 = math.rsqrt %21 : vector<16x1xf32>
    %23 = vector.broadcast %22 : vector<16x1xf32> to vector<16x128xf32>
    %24 = arith.mulf %14, %23 : vector<16x128xf32>
    %25 = vector.broadcast %5 : vector<1x128xf32> to vector<16x128xf32>
    %26 = arith.mulf %24, %25 : vector<16x128xf32>
    %27 = vector.broadcast %6 : vector<1x128xf32> to vector<16x128xf32>
    %28 = arith.addf %26, %27 : vector<16x128xf32>
    %29 = arith.truncf %28 : vector<16x128xf32> to vector<16x128xbf16>
    %c0_10 = arith.constant 0 : index
    %c0_11 = arith.constant 0 : index
    %30 = vector.load %arg4[%c0_10, %c0_11] : memref<16x128xbf16, #tpu.memory_space<vmem>>, vector<16x128xbf16>
    tpu.vector_store %arg4[%c0_10, %c0_11], %29 {strides = array<i32>} : memref<16x128xbf16, #tpu.memory_space<vmem>>, vector<16x128xbf16>,
    return
  }
  func.func @transform_0(%arg0: i32) -> (i32, i32) {
    %c0_i32 = arith.constant 0 : i32
    %c0_i32_0 = arith.constant 0 : i32
    return %arg0, %c0_i32 : i32, i32
  }
  func.func @transform_1(%arg0: i32) -> (i32, i32) {
    %c0_i32 = arith.constant 0 : i32
    %c0_i32_0 = arith.constant 0 : i32
    %c0_i32_1 = arith.constant 0 : i32
    return %c0_i32, %c0_i32_0 : i32, i32
  }
  func.func @transform_2(%arg0: i32) -> (i32, i32) {
    %c0_i32 = arith.constant 0 : i32
    %c0_i32_0 = arith.constant 0 : i32
    %c0_i32_1 = arith.constant 0 : i32
    return %c0_i32, %c0_i32_0 : i32, i32
  }
  func.func @transform_3(%arg0: i32) -> (i32, i32) {
    %c0_i32 = arith.constant 0 : i32
    %c0_i32_0 = arith.constant 0 : i32
    return %arg0, %c0_i32 : i32, i32
  }
}

</mosaic_0001>

<bundles_post_ra>
// kernel: tpu_custom_call.1
= control target key start
LH: loop header
LB: loop body
LE: loop exit
PB: predicated region body
PF: predicated region fallthrough
CT: control target
= control target key end

     0   :  { %8 = vsyncpa [#allocation3], 0  ;;  %s1002_s0 = inlined_call_operand.hbm [shape: bf16[32,192], index: 0, kind: input, shape index: {}]   ;;  %s1003_s1 = inlined_call_operand.hbm [shape: bf16[192,128], index: 1, kind: input, shape index: {}]   ;;  %s1004_s2 = inlined_call_operand.vmem [shape: f32[3,128], index: 2, kind: input, shape index: {}]   ;;  %s1005_s3 = inlined_call_operand.hbm [shape: bf16[32,128], index: 3, kind: output, shape index: {}]  }
   0x1   :  { %10 = vsyncpa [#allocation3 + $0x1], 0 }
   0x2   :  { %11 = vsyncpa [#allocation6], 0 }
   0x3   :  { %12 = vsyncpa [#allocation4], 0 }
   0x4   :  { %14 = vsyncpa [#allocation4 + $0x1], 0  ;;  %s793_s12 = smov 0   ;;  %s795_s13 = smov 0  }
   0x5   :  { %s797_s14 = smov 0   ;;  %s799_s15 = smov 0  }
   0x6 LB: > { %s814_s16 = sadd.s32 4294967295, %s761_s15   ;;  %s506_s17 = sadd.s32 4294967294, %s761_s15   ;;  %s761_s15 = sphi %s799_s15, %s1025_s15   ;;  %s757_s14 = sphi %s797_s14, %s1024_s14   ;;  %s753_s13 = sphi %s795_s13, %s1023_s13   ;;  %s749_s12 = sphi %s793_s12, %s1022_s12  }
   0x7   : > { %p40_p0 = scmp.ne.s32.totalorder %s753_s13, %s749_s12  ;;  %p1006_p1 = scmp.eq.s32.totalorder %s814_s16, 0 }
   0x8   : > { %p112_p3 = scmp.eq.s32.totalorder %s506_s17, 1  ;;  %p507_p5 = scmp.ge.s32.totalorder %s761_s15, 1 }
   0x9   : > { %p823_p4 = por %p1006_p1, %p40_p0  ;;  %p119_p7 = scmp.lt.s32.totalorder %s761_s15, 3 }
   0xa   : > { %p828_p6 = por %p112_p3, %p40_p0  ;;  %s763_s21 = smov [#allocation5]  }
   0xb   : > { %s1009_s18 = scalar_select %p823_p4, 1, 0 }
   0xc   : > { %s1010_s19 = scalar_select %p828_p6, 1, 0 }
   0xd   : > { %p833_p8 = pnand %p507_p5, %p119_p7  ;;  %s131_s22 = sshll.u32 %s763_s21, 4  ;;  %s837_s22 = int_to_ptr.vmem [resolvable:$true] %s131_s22 }
   0xe   : > { %s849_s24 = sadd.s32 1, %s761_s15   ;;  %s27_s25 = sadd.s32 1, %s757_s14 }
   0xf   : > { %s1011_s20 = scalar_select %p833_p8, 1, 0 }
  0x10   : > { %p558_p9 = pneg %p833_p8  ;;  %s24_s26 = ssub.s32 %s761_s15, %s849_s24 }
  0x11   : > { %s633_s29 = scalar_lea.hbm %s1003_s1, 1536 }
  0x12   : > { %p844_p11 = pnand %p558_p9, %p1006_p1  ;;  %p634_p12 = scmp.ne.s32.totalorder %s1003_s1, %s633_s29 }
  0x13   : > { %p640_p5 = scmp.lt.u32.totalorder %s633_s29, %s1003_s1 }
  0x14   : > { %p635_p13 = pneg %p844_p11 }
  0x16   : > { %p636_p0 = pnand %p635_p13, %p634_p12 }
  0x18   : > { %p637_p3 = pneg %p636_p0 }
  0x1a   : > { %p642_p7 = pnand %p640_p5, %p637_p3 }
  0x1c   : > { %645 = shalt.err (!%p642_p7)
}
  0x1d   : > { %s646_s7 = scalar_lea.vmem %s837_s22, 1536  ;;  %p654_p2 = scmp.lt.s32.totalorder %s837_s22, %s837_s22 }
  0x1e   : > { %p647_p9 = scmp.ne.s32.totalorder %s837_s22, %s646_s7  ;;  %p655_p6 = scmp.lt.s32.totalorder %s646_s7, %s646_s7 }
  0x20   : > { %p649_p10 = pnand %p647_p9, %p635_p13  ;;  %p656_p4 = por %p655_p6, %p654_p2 }
  0x22   : > { %p650_p1 = pneg %p649_p10 }
  0x24   : > { %p657_p8 = pnand %p656_p4, %p650_p1 }
  0x26   : > { %660 = shalt.err (!%p657_p8)
}
  0x27   : > { %s764_s8 = smov 64   ;;  %s765_s9 = smov 4  }
  0x28   : > { %561 = dma.hbm_to_vmem [thread:$0]  (!%p844_p11), %s1003_s1, 1536, %s837_s22, [#allocation6], %s764_s8, %s764_s8, %s765_s9  }
  0x29   : > { %p25_p2 = scmp.eq.s32.totalorder %s24_s26, 0  ;;  %p34_p1 = scmp.ne.s32.totalorder %s757_s14, %s753_s13 }
  0x2a   : > { %p35_p4 = scmp.eq.s32.totalorder %s761_s15, 0  ;;  %p571_p6 = scmp.lt.s32.totalorder %s761_s15, 2 }
  0x2b   : > { %s880_s17 = scalar_select %p25_p2, %s757_s14, %s27_s25  }
  0x2c   : > { %p36_p8 = por %p35_p4, %p34_p1  ;;  %p1013_p10 = scmp.eq.s32.totalorder %s814_s16, 1 }
  0x2d   : > { %s148_s27 = sand.u32 1, %s757_s14   ;;  %s541_s28 = sshll.u32 %s761_s15, 8 }
  0x2e   : > { %p884_p12 = por %p1013_p10, %p34_p1  ;;  %s510_s29 = sshll.u32 %s148_s27, 4 }
  0x2f   : > { %s893_s4 = scalar_lea.hbm %s1002_s0, %s541_s28  ;;  %s152_s22 = scalar_lea.vmem [#allocation2], %s510_s29 }
  0x30   : > { %s160_s25 = sshll.u32 %s152_s22, 4  ;;  %p895_p11 = pnand %p571_p6, %p36_p8  ;;  %s899_s25 = int_to_ptr.vmem [resolvable:$true] %s160_s25 }
  0x31   : > { %s901_s5 = scalar_lea.sflag [#allocation3], %s148_s27  ;;  %s661_s6 = scalar_lea.hbm %s893_s4, 256 }
  0x32   : > { %p662_p13 = scmp.ne.s32.totalorder %s893_s4, %s661_s6  ;;  %p663_p0 = pneg %p895_p11 }
  0x33   : > { %s666_s9 = scalar_lea.hbm %s1002_s0, 512  ;;  %p667_p7 = scmp.lt.u32.totalorder %s893_s4, %s1002_s0 }
  0x34   : > { %p664_p3 = pnand %p663_p0, %p662_p13  ;;  %p668_p9 = scmp.lt.u32.totalorder %s666_s9, %s661_s6 }
  0x35   : > { %p670_p1 = scmp.lt.u32.totalorder %s661_s6, %s893_s4 }
  0x36   : > { %p665_p5 = pneg %p664_p3  ;;  %p669_p2 = por %p668_p9, %p667_p7 }
  0x38   : > { %p671_p4 = por %p670_p1, %p669_p2 }
  0x3a   : > { %p672_p6 = pnand %p671_p4, %p665_p5 }
  0x3c   : > { %675 = shalt.err (!%p672_p6)
}
  0x3d   : > { %s676_s27 = scalar_lea.vmem %s899_s25, 256  ;;  %s766_s28 = smov [#allocation2]  }
  0x3e   : > { %p677_p8 = scmp.ne.s32.totalorder %s899_s25, %s676_s27  ;;  %s681_s29 = sshll.u32 %s766_s28, 4  ;;  %s682_s29 = int_to_ptr.vmem [resolvable:$false] %s681_s29 }
  0x3f   : > { %s683_s23 = scalar_lea.vmem %s682_s29, 512  ;;  %p684_p3 = scmp.lt.s32.totalorder %s899_s25, %s682_s29 }
  0x40   : > { %p679_p10 = pnand %p677_p8, %p663_p0  ;;  %p685_p7 = scmp.lt.s32.totalorder %s683_s23, %s676_s27 }
  0x42   : > { %p680_p13 = pneg %p679_p10  ;;  %p686_p9 = por %p685_p7, %p684_p3 }
  0x44   : > { %p687_p2 = pnand %p686_p9, %p680_p13 }
  0x46   : > { %690 = shalt.err (!%p687_p2)
}
  0x47   : > { %s767_s30 = smov 128   ;;  %s768_s22 = smov 8  }
  0x48   : > { %565 = dma.hbm_to_vmem [thread:$0]  (!%p895_p11), %s893_s4, 256, %s899_s25, %s901_s5, %s767_s30, %s767_s30, %s768_s22  }
  0x49   : > { %p1016_p0 = scmp.ne.s32.totalorder %s1011_s20, 0 }
  0x4a   : > { %s932_s6 = sand.u32 (!%p1016_p0), 1, %s753_s13   ;;  %p1017_p5 = scmp.ne.s32.totalorder (!%p1016_p0), %s1009_s18, 0 }
  0x4b   : > { %172 = sbr.rel (%p1016_p0) target bundleno = 681 (0x2a9), region = 32  ;;  %s515_s7 = sshll.u32 (!%p1016_p0), %s932_s6, 4 }
  0x4c   : > { %s175_s8 = scalar_lea.sflag (!%p1016_p0), [#allocation3], %s932_s6  ;;  %s936_s9 = scalar_lea.vmem (!%p1016_p0), [#allocation2], %s515_s7 }
  0x52   : > { %736 = dma.done.wait (%p1017_p5), %s175_s8, 256  }
  0x53   : > { %738 = vsyncadd (%p1017_p5), %s175_s8, 4294967040  ;;  %p1018_p11 = scmp.eq.s32.totalorder %s814_s16, 0 }
  0x55   : > { %740 = dma.done.wait (%p1018_p11), [#allocation6], 1536   ;;  %p1019_p1 = pmov %p1018_p11 }
  0x56   : > { %v769_v0 = vmov 0   ;;  %v614_v1 = vld [vmem:[#allocation5] sm:$0xff]   ;;  %v615_v2 = vld [vmem:[#allocation5 + $0x8] sm:$0xff]   ;;  %v616_v3 = vld [vmem:[#allocation5 + $0x10] sm:$0xff]   ;;  %vm320_vm0 = vcmask 523264   ;;  %v235_v15 = vlaneseq  ;;  %s517_s4 = sshll.u32 %s932_s6, 3 }
  0x57   : > { %742 = vsyncadd (%p1019_p1), [#allocation6], 4294965760  ;;  %324 = vmatprep.subr.bf16.mxu0 %v769_v0  ;;  %v617_v4 = vld [vmem:[#allocation5 + $0x18] sm:$0xff]   ;;  %v618_v6 = vld [vmem:[#allocation5 + $0x20] sm:$0xff]   ;;  %s544_s25 = sshll.u32 %s814_s16, 7  ;;  %s204_s26 = scalar_lea.vmem [#allocation7], %s517_s4 }
  0x58   : > { %325 = vmatpush1.bf16.msra.mxu0 %v614_v1  ;;  %v628_v5 = vld [vmem:[%s936_s9 + $0x4] ss:$8 sps:$4 sm:$0xff]   ;;  %v626_v14 = vld [vmem:[%s936_s9] ss:$8 sps:$4 sm:$0xff]   ;;  %v236_v16 = vshrl.u32 %v235_v15, 7  ;;  %s423_s5 = sshll.u32 %s204_s26, 4  ;;  %s956_s27 = scalar_lea.hbm %s1005_s3, %s544_s25  ;;  %s958_s5 = int_to_ptr.vmem [resolvable:$true] %s423_s5 }
  0x59   : > { %326 = vmatprep.subr.bf16.mxu0 %v769_v0  ;;  %532 = vmatprep.mubr.msk.bf16.mxu0 %vm320_vm0, %v628_v5  ;;  %v619_v7 = vld [vmem:[#allocation5 + $0x28] sm:$0xff]   ;;  %v620_v8 = vld [vmem:[#allocation5 + $0x30] sm:$0xff]   ;;  %v621_v9 = vld [vmem:[#allocation5 + $0x38] sm:$0xff]   ;;  %s410_s28 = scalar_lea.sflag [#allocation4], %s932_s6  ;;  %s691_s29 = scalar_lea.vmem %s958_s5, 128 }
  0x5a   : > { %v622_v10 = vld [vmem:[#allocation5 + $0x40] sm:$0xff]   ;;  %v623_v11 = vld [vmem:[#allocation5 + $0x48] sm:$0xff]   ;;  %v624_v12 = vld [vmem:[#allocation5 + $0x50] sm:$0xff]   ;;  %v237_v17 = vsub.s32 0, %v236_v16  ;;  %v389_v40 = vsub.s32 1, %v236_v16  ;;  %v395_v43 = vsub.s32 2, %v236_v16  ;;  %p692_p4 = scmp.ne.s32.totalorder %s958_s5, %s691_s29 }
  0x5b   : > { %v625_v13 = vld [vmem:[#allocation5 + $0x58] sm:$0xff]   ;;  %v234_v18 = vld [vmem:[%s1004_s2] sm:$0x7]  ;;  %s770_s16 = smov [#allocation7]  }
  0x5c   : > { %327 = vmatpush1.bf16.msra.mxu0 %v615_v2  ;;  %v238_v19 = vrot.slane %v234_v18, %v237_v17  ;;  %v390_v42 = vrot.slane %v234_v18, %v389_v40  ;;  %v396_v46 = vrot.slane %v234_v18, %v395_v43  ;;  %p693_p6 = pnand %p692_p4, %p884_p12  ;;  %s695_s23 = sshll.u32 %s770_s16, 4  ;;  %s696_s23 = int_to_ptr.vmem [resolvable:$false] %s695_s23 }
  0x5d   : > { %328 = vmatprep.subr.bf16.mxu0 %v769_v0  ;;  %s697_s30 = scalar_lea.vmem %s696_s23, 256  ;;  %p698_p10 = scmp.lt.s32.totalorder %s958_s5, %s696_s23 }
  0x5e   : > { %p694_p8 = pneg %p693_p6  ;;  %p699_p13 = scmp.lt.s32.totalorder %s697_s30, %s691_s29 }
  0x60   : > { %329 = vmatpush1.bf16.msra.mxu0 %v616_v3  ;;  %p700_p3 = por %p699_p13, %p698_p10 }
  0x61   : > { %330 = vmatprep.subr.bf16.mxu0 %v769_v0 }
  0x62   : > { %p701_p7 = pnand %p700_p3, %p694_p8 }
  0x64   : > { %331 = vmatpush1.bf16.msra.mxu0 %v617_v4 }
  0x65   : > { %332 = vmatprep.subr.bf16.mxu0 %v769_v0 }
  0x68   : > { %333 = vmatpush1.bf16.msra.mxu0 %v618_v6 }
  0x69   : > { %334 = vmatprep.subr.bf16.mxu0 %v769_v0 }
  0x6c   : > { %335 = vmatpush1.bf16.msra.mxu0 %v619_v7 }
  0x6d   : > { %336 = vmatprep.subr.bf16.mxu0 %v769_v0 }
  0x70   : > { %337 = vmatpush1.bf16.msra.mxu0 %v620_v8 }
  0x71   : > { %338 = vmatprep.subr.bf16.mxu0 %v769_v0 }
  0x74   : > { %339 = vmatpush1.bf16.msra.mxu0 %v621_v9 }
  0x75   : > { %340 = vmatprep.subr.bf16.mxu0 %v769_v0 }
  0x78   : > { %341 = vmatpush1.bf16.msra.mxu0 %v622_v10 }
  0x79   : > { %342 = vmatprep.subr.bf16.mxu0 %v769_v0 }
  0x7c   : > { %343 = vmatpush1.bf16.msra.mxu0 %v623_v11 }
  0x7d   : > { %344 = vmatprep.subr.bf16.mxu0 %v769_v0 }
  0x80   : > { %345 = vmatpush1.bf16.msra.mxu0 %v624_v12 }
  0x81   : > { %346 = vmatprep.subr.bf16.mxu0 %v769_v0 }
  0x84   : > { %347 = vmatpush1.bf16.msra.mxu0 %v625_v13 }
  0x87   : > { %357 = vmatmul.mubr.bf16.vlgmr.msra.gmra.mrb[0].mxu0 %v626_v14 }
 0x15a   : > { %v358_v20 = vpop.f32.mrb[0].mxu0 }
 0x15b   : > { %v359_v21 = vadd.f32 %v358_v20, %v238_v19  ;;  %v360_v22 = vpop.f32.mrb[1].mxu0 }
 0x15c   : > { %v361_v23 = vpop.f32.mrb[2].mxu0 }
 0x15d   : > { %v363_v24 = vpop.f32.mrb[3].mxu0  ;;  %365 = vadd.xlane.f32.xlu0 %v359_v21  ;;  %v362_v25 = vadd.f32 %v361_v23, %v238_v19 }
 0x161   : > { %367 = vadd.xlane.f32.xlu0 %v362_v25 }
 0x1ea   : > { %v366_v26 = vpop.xlane.xlu0 %365 }
 0x1eb   : > { %v369_v27 = vmul.f32 0.0078125, %v366_v26 }
 0x1ed   : > { %v371_v28 = vsub.f32 %v359_v21, %v369_v27 }
 0x1ee   : > { %v368_v29 = vpop.xlane.xlu0 %367 }
 0x1ef   : > { %v370_v30 = vmul.f32 0.0078125, %v368_v29  ;;  %v373_v31 = vmul.f32 %v371_v28, %v371_v28 }
 0x1f1   : > { %v372_v32 = vsub.f32 %v362_v25, %v370_v30  ;;  %375 = vadd.xlane.f32.xlu1 %v373_v31 }
 0x1f3   : > { %v374_v33 = vmul.f32 %v372_v32, %v372_v32 }
 0x1f5   : > { %377 = vadd.xlane.f32.xlu1 %v374_v33 }
 0x27e   : > { %v376_v34 = vpop.xlane.xlu1 %375 }
 0x27f   : > { %v379_v35 = vmul.f32 0.0078125, %v376_v34 }
 0x281   : > { %v381_v36 = vadd.f32 1e-05, %v379_v35 }
 0x282   : > { %v378_v37 = vpop.xlane.xlu1 %377 }
 0x283   : > { %629 = vrsqrt.f32 %v381_v36  ;;  %v380_v38 = vmul.f32 0.0078125, %v378_v37 }
 0x285   : > { %v382_v39 = vadd.f32 1e-05, %v380_v38 }
 0x287   : > { %631 = vrsqrt.f32 %v382_v39 }
 0x28d   : > { %v630_v41 = vpop.eup %629 }
 0x28e   : > { %v385_v44 = vmul.f32 %v630_v41, %v371_v28 }
 0x290   : > { %v391_v47 = vmul.f32 %v390_v42, %v385_v44 }
 0x291   : > { %v632_v45 = vpop.eup %631 }
 0x292   : > { %v386_v48 = vmul.f32 %v632_v45, %v372_v32  ;;  %v397_v50 = vadd.f32 %v396_v46, %v391_v47 }
 0x294   : > { %v392_v49 = vmul.f32 %v390_v42, %v386_v48 }
 0x296   : > { %v398_v51 = vadd.f32 %v396_v46, %v392_v49 }
 0x298   : > { %v548_v52 = vpack.c.bf16 %v398_v51, %v397_v50 }
 0x29a   : > { %549 = vst [vmem:[%s204_s26] sm:$0xff] %v548_v52  }
 0x29b   : > { %704 = shalt.err (!%p701_p7)
}
 0x29c   : > { %s705_s22 = scalar_lea.hbm %s956_s27, 128  ;;  %s709_s9 = scalar_lea.hbm %s1005_s3, 256 }
 0x29d   : > { %p706_p9 = scmp.ne.s32.totalorder %s956_s27, %s705_s22  ;;  %p710_p5 = scmp.lt.u32.totalorder %s956_s27, %s1005_s3 }
 0x29e   : > { %p711_p11 = scmp.lt.u32.totalorder %s709_s9, %s705_s22  ;;  %p713_p4 = scmp.lt.u32.totalorder %s705_s22, %s956_s27 }
 0x29f   : > { %p707_p2 = pnand %p706_p9, %p884_p12 }
 0x2a0   : > { %p712_p1 = por %p711_p11, %p710_p5 }
 0x2a1   : > { %p708_p0 = pneg %p707_p2 }
 0x2a2   : > { %p714_p6 = por %p713_p4, %p712_p1 }
 0x2a4   : > { %p715_p8 = pnand %p714_p6, %p708_p0 }
 0x2a6   : > { %718 = shalt.err (!%p715_p8)
}
 0x2a7   : > { %s771_s4 = smov 64   ;;  %s772_s25 = smov 4  }
 0x2a8   : > { %556 = dma.vmem_to_hbm [thread:$0]  (%p884_p12), %s958_s5, 128, %s956_s27, %s410_s28, %s771_s4, %s771_s4, %s772_s25  }
 0x2a9 PF: > { %s438_s26 = sand.u32 1, %s749_s12   ;;  %p1020_p10 = scmp.ne.s32.totalorder %s1010_s19, 0 }
 0x2aa   : > { %p1021_p13 = scmp.ge.s32.totalorder %s761_s15, 2  ;;  %s439_s10 = scalar_lea.sflag [#allocation4], %s438_s26 }
 0x2ac   : > { %p567_p3 = pnand %p1021_p13, %p1020_p10 }
 0x2ae   : > { %744 = dma.done.wait (!%p567_p3), %s439_s10, 128  }
 0x2af   : > { %746 = vsyncadd (!%p567_p3), %s439_s10, 4294967168  ;;  %p17_p7 = scmp.ge.s32.totalorder %s849_s24, 4   ;;  %s1022_s12 = smov %s753_s13 }
 0x2b0   : > { %s1023_s13 = smov %s757_s14  ;;  %s1024_s14 = smov %s880_s17 }
 0x2b1   : > { %s1025_s15 = smov %s849_s24  ;;  %19 = sbr.rel (!%p17_p7) target bundleno = 6 (0x6), region = 81 }
 0x2b8   :  { %444 = vsyncpa [#allocation3], 1 }
 0x2b9   :  { %446 = vsyncpa [#allocation3 + $0x1], 1 }
 0x2ba   :  { %447 = vsyncpa [#allocation6], 1 }
 0x2bb   :  { %448 = vsyncpa [#allocation4], 1 }
 0x2bc   :  { %450 = vsyncpa [#allocation4 + $0x1], 1 }

</bundles_post_ra>
